<compile_context>
chip_gen: v7x
topology: tpu7x:2x2x1
jax: 0.10.0
libtpu: 0.0.40
codegen_flags: <defaults>
</compile_context>

<pallas_src>
import math

import jax
import jax.numpy as jnp
from jax.experimental import pallas as pl
from jax.experimental.pallas import tpu as pltpu


# ---------------------------------------------------------------------------
# Kernel 1: fused per-head QKV projection.  Grid (B, S // TS, H).
#   x block : [TS, E]      bf16 input tile
#   w block : [E, 3*Dp]    bf16 concatenated (scaled-q | k | v) weights, head h
#   b block : [1, 3*Dp]    f32 bias (q part pre-scaled by 1/sqrt(Dh))
#   outputs : [TS, Dp]     lane-dense slabs of head-major [B, H, S, Dp] Q/K/V
# ---------------------------------------------------------------------------
def qkv_proj_kernel(x_ref, w_ref, b_ref, q_ref, k_ref, v_ref):
    dp = q_ref.shape[-1]
    y = jnp.dot(x_ref[...], w_ref[...],
                preferred_element_type=jnp.float32) + b_ref[...]
    y = y.astype(jnp.bfloat16)                        # [TS, 3*Dp]
    q_ref[...] = y[:, :dp]
    k_ref[...] = y[:, dp:2 * dp]
    v_ref[...] = y[:, 2 * dp:]


# ---------------------------------------------------------------------------
# Kernel 2: flash-style attention + out-proj + LN1 + FFN + LN2.
# Grid (B, S // TQ, S // TK); the last (K/V) axis is "arbitrary" and carries
# online-softmax state in scratch; the encoder tail runs on the last K/V step.
# ---------------------------------------------------------------------------
def encoder_core_kernel(q_ref, k_ref, v_ref, x_ref, wo_ref, bo_ref,
                        w1_ref, b1_ref, w2_ref, b2_ref,
                        g1_ref, be1_ref, g2_ref, be2_ref,
                        o_ref, m_sc, l_sc, acc_sc):
    ki = pl.program_id(2)
    num_heads = acc_sc.shape[0]

    @pl.when(ki == 0)
    def _():
        m_sc[...] = jnp.full(m_sc.shape, -jnp.inf, m_sc.dtype)
        l_sc[...] = jnp.zeros(l_sc.shape, l_sc.dtype)
        acc_sc[...] = jnp.zeros(acc_sc.shape, acc_sc.dtype)

    # ---- online-softmax attention over this K/V tile (batched over heads) --
    q = q_ref[...]                                    # [H, TQ, Dp] bf16 (pre-scaled)
    k = k_ref[...]                                    # [H, TK, Dp] bf16
    v = v_ref[...]                                    # [H, TK, Dp] bf16

    s = jnp.einsum('hqd,hkd->hqk', q, k,
                   preferred_element_type=jnp.float32)          # [H, TQ, TK]
    m_prev = m_sc[...]
    m_new = jnp.maximum(m_prev, jnp.max(s, axis=-1, keepdims=True))
    alpha = jnp.exp(m_prev - m_new)
    p = jnp.exp(s - m_new)
    l_sc[...] = alpha * l_sc[...] + jnp.sum(p, axis=-1, keepdims=True)
    acc_sc[...] = alpha * acc_sc[...] + jnp.einsum(
        'hqk,hkd->hqd', p.astype(jnp.bfloat16), v,
        preferred_element_type=jnp.float32)                     # [H, TQ, Dp]
    m_sc[...] = m_new

    # ---- finalize on the last K/V tile: out-proj + LN1 + FFN + LN2 ---------
    @pl.when(ki == pl.num_programs(2) - 1)
    def _():
        inv_l = pl.reciprocal(l_sc[...], approx=True)           # [H, TQ, 1]
        # Lane-aligned per-head concat -> [TQ, H*Dp] slab, then ONE K=H*Dp
        # out-projection GEMM (no [H,TQ,E] temporary, no cross-head VPU sum).
        vals = jnp.concatenate(
            [(acc_sc[h] * inv_l[h]).astype(jnp.bfloat16)
             for h in range(num_heads)], axis=-1)               # [TQ, H*Dp]
        attn_out = jnp.dot(vals, wo_ref[...],
                           preferred_element_type=jnp.float32) + bo_ref[...]

        # residual + LayerNorm 1 (f32 statistics)
        x1 = x_ref[...] + attn_out
        mu1 = jnp.mean(x1, axis=-1, keepdims=True)
        var1 = jnp.mean(jnp.square(x1 - mu1), axis=-1, keepdims=True)
        xn1 = (x1 - mu1) * jax.lax.rsqrt(var1 + 1e-5) * g1_ref[...] + be1_ref[...]

        # feed-forward network (bf16 MXU matmuls, f32 accumulation)
        h1 = jnp.dot(xn1.astype(jnp.bfloat16), w1_ref[...],
                     preferred_element_type=jnp.float32) + b1_ref[...]
        h1 = jnp.maximum(h1, 0.0)                               # ReLU
        ffn = jnp.dot(h1.astype(jnp.bfloat16), w2_ref[...],
                      preferred_element_type=jnp.float32) + b2_ref[...]

        # residual + LayerNorm 2 (f32 statistics)
        x2 = xn1 + ffn
        mu2 = jnp.mean(x2, axis=-1, keepdims=True)
        var2 = jnp.mean(jnp.square(x2 - mu2), axis=-1, keepdims=True)
        o_ref[...] = ((x2 - mu2) * jax.lax.rsqrt(var2 + 1e-5) * g2_ref[...]
                      + be2_ref[...]).astype(o_ref.dtype)


# ---------------------------------------------------------------------------
# Wrapper helpers.
# ---------------------------------------------------------------------------
def _physical_vmem_bytes():
    # Generation-aware budget (v5e/v6e: 128 MiB, v7x: 64 MiB per TensorCore).
    try:
        return int(getattr(pltpu.get_tpu_info(), "vmem_capacity_bytes"))
    except Exception:
        return 64 << 20          # conservative default (v7x-sized)


def _vmem_limit(needed_bytes):
    # Never request the full physical VMEM -- leave headroom for Mosaic's
    # internal scratch and pipeline slop.
    cap = int(_physical_vmem_bytes() * 0.85)
    return int(min(max(needed_bytes + (4 << 20), 16 << 20), cap))


def _pick_tile(n, target):
    """Largest nice divisor of n that is <= target (multiples of 8 only)."""
    for t in (1024, 512, 256, 128, 64, 32, 16, 8):
        if t <= target and n % t == 0:
            return t
    return n


def _pad_dim(a, axis, size):
    pad = size - a.shape[axis]
    if pad == 0:
        return a
    cfg = [(0, 0)] * a.ndim
    cfg[axis] = (0, pad)
    return jnp.pad(a, cfg)


def encoder_block(x, params, *, num_heads, q_tile=None, kv_tile=None,
                  seq_tile=None, out_dtype=None):
    """Forward pass of the PyTorch EncoderBlock (eval mode, mask=None)."""
    B, S, E = x.shape
    H = num_heads
    assert E % H == 0
    Dh = E // H
    F = params["w1"].shape[1]
    Dp = ((Dh + 127) // 128) * 128          # lane-dense (padded) head dim
    scale = 1.0 / math.sqrt(Dh)

    # 256-wide q tiles match the 256x256 MXU on v6e/v7x (v5e's 128x128 MXU is
    # already saturated at 128); K/V tiles larger to amortize per-step cost.
    TS = _pick_tile(S, seq_tile if seq_tile else 256)
    TQ = _pick_tile(S, q_tile if q_tile else 256)
    TK = _pick_tile(S, kv_tile if kv_tile else 512)
    # v7x megacore: keep >= 2 parallel (b, q-tile) steps so both cores work.
    while B * (S // TQ) < 2 and TQ % 16 == 0 and S % (TQ // 2) == 0:
        TQ //= 2

    f32, bf16 = jnp.float32, jnp.bfloat16
    out_dtype = out_dtype if out_dtype is not None else x.dtype

    # --- weight repacking (layout plumbing lives here, not in-kernel) -------
    # PyTorch qkv layout: nn.Linear(E, 3E) columns are per-head [q_h|k_h|v_h]
    # blocks of 3*Dh (as the reshape(B,S,H,3*Dh) in forward() implies).
    w4 = params["wqkv"].reshape(E, H, 3, Dh)
    wq_h = _pad_dim(jnp.transpose(w4[:, :, 0, :], (1, 0, 2)) * scale, -1, Dp)
    wk_h = _pad_dim(jnp.transpose(w4[:, :, 1, :], (1, 0, 2)), -1, Dp)
    wv_h = _pad_dim(jnp.transpose(w4[:, :, 2, :], (1, 0, 2)), -1, Dp)
    w_qkv = jnp.concatenate([wq_h, wk_h, wv_h], axis=-1).astype(bf16)  # [H,E,3Dp]
    b4 = params["bqkv"].reshape(H, 3, Dh)
    b_qkv = jnp.concatenate(
        [_pad_dim(b4[:, 0, :] * scale, -1, Dp),
         _pad_dim(b4[:, 1, :], -1, Dp),
         _pad_dim(b4[:, 2, :], -1, Dp)],
        axis=-1).reshape(H, 1, 3 * Dp).astype(f32)

    # Out-projection rows are head-major; pad each head's Dh rows to Dp with
    # zeros so padded value lanes contribute exactly nothing.
    wo_slab = _pad_dim(params["wo"].reshape(H, Dh, E), 1, Dp)
    wo_slab = wo_slab.reshape(H * Dp, E).astype(bf16)
    bo = params["bo"].astype(f32)
    w1 = params["w1"].astype(bf16)
    b1 = params["b1"].astype(f32)
    w2 = params["w2"].astype(bf16)
    b2 = params["b2"].astype(f32)
    g1, be1 = params["g1"].astype(f32), params["be1"].astype(f32)
    g2, be2 = params["g2"].astype(f32), params["be2"].astype(f32)

    x_f32 = x.astype(f32)      # residual path (kernel 2)
    x_bf16 = x.astype(bf16)    # MXU input (kernel 1): half the HBM read

    # ----------------- kernel 1: fused QKV projection -----------------------
    proj_bytes = (2 * TS * E * 2
                  + 2 * (E * 3 * Dp * 2 + 3 * Dp * 4)
                  + 3 * 2 * TS * Dp * 2
                  + TS * 3 * Dp * 4)
    qkv_out_spec = pl.BlockSpec((pl.Squeezed(), pl.Squeezed(), TS, Dp),
                                lambda b, si, h: (b, h, si, 0))

    q, k, v = pl.pallas_call(
        qkv_proj_kernel,
        out_shape=tuple(jax.ShapeDtypeStruct((B, H, S, Dp), bf16)
                        for _ in range(3)),
        grid_spec=pltpu.PrefetchScalarGridSpec(
            num_scalar_prefetch=0,
            grid=(B, S // TS, H),
            in_specs=[
                pl.BlockSpec((pl.Squeezed(), TS, E), lambda b, si, h: (b, si, 0)),
                pl.BlockSpec((pl.Squeezed(), E, 3 * Dp), lambda b, si, h: (h, 0, 0)),
                pl.BlockSpec((pl.Squeezed(), 1, 3 * Dp), lambda b, si, h: (h, 0, 0)),
            ],
            out_specs=(qkv_out_spec, qkv_out_spec, qkv_out_spec),
        ),
        compiler_params=pltpu.CompilerParams(
            dimension_semantics=("parallel", "parallel", "parallel"),
            vmem_limit_bytes=_vmem_limit(proj_bytes)),
    )(x_bf16, w_qkv, b_qkv)

    # ----------------- kernel 2: flash attention + FFN + LayerNorms ---------
    core_bytes = (2 * H * TQ * Dp * 2                       # q blocks
                  + 2 * 2 * H * TK * Dp * 2                 # k, v blocks
                  + 2 * TQ * E * 4                          # x blocks
                  + (H * Dp * E + E * F + F * E) * 2        # const weights
                  + (7 * E + F) * 4                         # const biases/LN
                  + 2 * TQ * E * 4                          # out blocks
                  + 2 * H * TQ * 128 * 4 + H * TQ * Dp * 4  # m/l/acc scratch
                  + 2 * H * TQ * TK * 4 + H * TQ * Dp * 4   # s/p, pv temps
                  + TQ * H * Dp * 2 + 4 * TQ * E * 4 + TQ * F * 4)

    def run_core(single_buffer_consts):
        if single_buffer_consts:
            # Constant-index weights never change across the grid: a single
            # VMEM copy (no double-buffering) halves their footprint.
            def const(shape):
                return pl.BlockSpec(shape, lambda b, qi, ki: (0,) * len(shape),
                                    pipeline_mode=pl.Buffered(1))
        else:
            def const(shape):
                return pl.BlockSpec(shape, lambda b, qi, ki: (0,) * len(shape))

        return pl.pallas_call(
            encoder_core_kernel,
            out_shape=jax.ShapeDtypeStruct((B, S, E), out_dtype),
            grid_spec=pltpu.PrefetchScalarGridSpec(
                num_scalar_prefetch=0,
                grid=(B, S // TQ, S // TK),
                in_specs=[
                    pl.BlockSpec((pl.Squeezed(), H, TQ, Dp),
                                 lambda b, qi, ki: (b, 0, qi, 0)),
                    pl.BlockSpec((pl.Squeezed(), H, TK, Dp),
                                 lambda b, qi, ki: (b, 0, ki, 0)),
                    pl.BlockSpec((pl.Squeezed(), H, TK, Dp),
                                 lambda b, qi, ki: (b, 0, ki, 0)),
                    pl.BlockSpec((pl.Squeezed(), TQ, E),
                                 lambda b, qi, ki: (b, qi, 0)),
                    const((H * Dp, E)),                     # wo_slab
                    const((1, E)),                          # bo
                    const((E, F)),                          # w1
                    const((1, F)),                          # b1
                    const((F, E)),                          # w2
                    const((1, E)),                          # b2
                    const((1, E)), const((1, E)),           # g1, be1
                    const((1, E)), const((1, E)),           # g2, be2
                ],
                out_specs=pl.BlockSpec((pl.Squeezed(), TQ, E),
                                       lambda b, qi, ki: (b, qi, 0)),
                scratch_shapes=[pltpu.VMEM((H, TQ, 1), f32),
                                pltpu.VMEM((H, TQ, 1), f32),
                                pltpu.VMEM((H, TQ, Dp), f32)],
            ),
            compiler_params=pltpu.CompilerParams(
                dimension_semantics=("parallel", "parallel", "arbitrary"),
                vmem_limit_bytes=_vmem_limit(core_bytes)),
        )(q, k, v, x_f32, wo_slab, bo, w1, b1, w2, b2, g1, be1, g2, be2)

    try:
        return run_core(True)
    except Exception:
        # Fallback if pipeline_mode=pl.Buffered(1) is unsupported on this jax.
        return run_core(False)


def init_params(key, embed_dim, num_heads, dim_feedforward):
    """Synthetic params in the PyTorch module's layout: Linear weights stored
    as [in, out]; wqkv columns are per-head interleaved [q_h | k_h | v_h]
    blocks of 3*Dh (matching nn.Linear(E, 3E) + reshape(B, S, H, 3*Dh))."""
    del num_heads  # layout is implied by the reshape, not the init
    ks = jax.random.split(key, 4)

    def xavier(k, fan_in, fan_out):
        bound = math.sqrt(6.0 / (fan_in + fan_out))
        return jax.random.uniform(k, (fan_in, fan_out), jnp.float32, -bound, bound)

    E, F = embed_dim, dim_feedforward
    return {
        "wqkv": xavier(ks[0], E, 3 * E),
        "bqkv": jnp.zeros((1, 3 * E), jnp.float32),
        "wo":   xavier(ks[1], E, E),
        "bo":   jnp.zeros((1, E), jnp.float32),
        "w1":   xavier(ks[2], E, F),
        "b1":   jnp.zeros((1, F), jnp.float32),
        "w2":   xavier(ks[3], F, E),
        "b2":   jnp.zeros((1, E), jnp.float32),
        "g1":   jnp.ones((1, E), jnp.float32),
        "be1":  jnp.zeros((1, E), jnp.float32),
        "g2":   jnp.ones((1, E), jnp.float32),
        "be2":  jnp.zeros((1, E), jnp.float32),
    }


def encoder_block_ref(x, p, *, num_heads):
    """Pure-JAX f32 reference mirroring the PyTorch forward (eval mode)."""
    B, S, E = x.shape
    Dh = E // num_heads
    qkv = x @ p["wqkv"] + p["bqkv"]                              # [B, S, 3E]
    qkv = qkv.reshape(B, S, num_heads, 3 * Dh).transpose(0, 2, 1, 3)
    q, k, v = jnp.split(qkv, 3, axis=-1)
    logits = jnp.einsum("bhqd,bhkd->bhqk", q, k) / math.sqrt(Dh)
    attn = jax.nn.softmax(logits, axis=-1)
    vals = jnp.einsum("bhqk,bhkd->bhqd", attn, v).transpose(0, 2, 1, 3).reshape(B, S, E)
    o = vals @ p["wo"] + p["bo"]
    x1 = x + o
    mu = x1.mean(-1, keepdims=True)
    var = ((x1 - mu) ** 2).mean(-1, keepdims=True)
    xn1 = (x1 - mu) / jnp.sqrt(var + 1e-5) * p["g1"] + p["be1"]
    h = jnp.maximum(xn1 @ p["w1"] + p["b1"], 0.0)
    ffn = h @ p["w2"] + p["b2"]
    x2 = xn1 + ffn
    mu2 = x2.mean(-1, keepdims=True)
    var2 = ((x2 - mu2) ** 2).mean(-1, keepdims=True)
    return (x2 - mu2) / jnp.sqrt(var2 + 1e-5) * p["g2"] + p["be2"]


if __name__ == "__main__":
    # Small but representative shapes: head_dim = 64 (padded to 128 lanes),
    # and small tiles so the test exercises multiple q tiles and the online-
    # softmax accumulation across two K/V tiles (core grid (2, 2, 2)).
    B, S, E, H, F = 2, 128, 256, 4, 512

    key = jax.random.PRNGKey(0)
    kx, kp = jax.random.split(key)
    x = jax.random.normal(kx, (B, S, E), jnp.float32)
    params = init_params(kp, E, H, F)

    out = encoder_block(x, params, num_heads=H, q_tile=64, kv_tile=64, seq_tile=64)
    out = jax.block_until_ready(out)

    ref = encoder_block_ref(x, params, num_heads=H)
    assert out.shape == (B, S, E)
    max_err = float(jnp.max(jnp.abs(out - ref)))
    mean_err = float(jnp.mean(jnp.abs(out - ref)))
    # bf16 MXU path (f32 accumulation) + approx softmax reciprocal vs f32 ref.
    assert max_err < 1.2e-1 and mean_err < 2.5e-2, (max_err, mean_err)

    print("KERNEL_OK")
</pallas_src>

<mosaic_0001>
module attributes {stable_mosaic.version = 11 : i64} {
  func.func @qkv_proj_kernel(%arg0: i32, %arg1: i32, %arg2: i32, %arg3: memref<1x64x256xbf16, #tpu.memory_space<vmem>>, %arg4: memref<1x256x384xbf16, #tpu.memory_space<vmem>>, %arg5: memref<1x1x384xf32, #tpu.memory_space<vmem>>, %arg6: memref<1x1x64x128xbf16, #tpu.memory_space<vmem>>, %arg7: memref<1x1x64x128xbf16, #tpu.memory_space<vmem>>, %arg8: memref<1x1x64x128xbf16, #tpu.memory_space<vmem>>) attributes {dimension_semantics = [#tpu.dimension_semantics<parallel>, #tpu.dimension_semantics<parallel>, #tpu.dimension_semantics<parallel>], iteration_bounds = array<i64: 2, 2, 4>, scalar_prefetch = 0 : i64, scratch_operands = 0 : i64, tpu.core_type = #tpu.core_type<tc>, window_params = [{transform_indices = @transform_0, window_bounds = array<i64: 1, 64, 256>}, {transform_indices = @transform_1, window_bounds = array<i64: 1, 256, 384>}, {transform_indices = @transform_2, window_bounds = array<i64: 1, 1, 384>}, {transform_indices = @transform_3, window_bounds = array<i64: 1, 1, 64, 128>}, {transform_indices = @transform_4, window_bounds = array<i64: 1, 1, 64, 128>}, {transform_indices = @transform_5, window_bounds = array<i64: 1, 1, 64, 128>}]} {
    %c0 = arith.constant 0 : index
    %c0_0 = arith.constant 0 : index
    %c0_1 = arith.constant 0 : index
    %0 = vector.load %arg3[%c0, %c0_0, %c0_1] : memref<1x64x256xbf16, #tpu.memory_space<vmem>>, vector<1x64x256xbf16>
    %1 = vector.shape_cast %0 : vector<1x64x256xbf16> to vector<64x256xbf16>
    %c0_2 = arith.constant 0 : index
    %c0_3 = arith.constant 0 : index
    %c0_4 = arith.constant 0 : index
    %2 = vector.load %arg4[%c0_2, %c0_3, %c0_4] : memref<1x256x384xbf16, #tpu.memory_space<vmem>>, vector<1x256x384xbf16>
    %3 = vector.shape_cast %2 : vector<1x256x384xbf16> to vector<256x384xbf16>
    %cst = arith.constant dense<0.000000e+00> : vector<64x384xf32>
    %4 = tpu.matmul %1, %3, %cst {dimension_numbers = #tpu.dot_dimension_numbers<[1], [0], [0], [1], [0, 0, 1, 1], [], []>} : vector<64x256xbf16>, vector<256x384xbf16>, vector<64x384xf32> -> vector<64x384xf32>
    %c0_5 = arith.constant 0 : index
    %c0_6 = arith.constant 0 : index
    %c0_7 = arith.constant 0 : index
    %5 = vector.load %arg5[%c0_5, %c0_6, %c0_7] : memref<1x1x384xf32, #tpu.memory_space<vmem>>, vector<1x1x384xf32>
    %6 = vector.shape_cast %5 : vector<1x1x384xf32> to vector<1x384xf32>
    %7 = vector.broadcast %6 : vector<1x384xf32> to vector<64x384xf32>
    %8 = arith.addf %4, %7 : vector<64x384xf32>
    %9 = arith.truncf %8 : vector<64x384xf32> to vector<64x384xbf16>
    %10 = vector.extract_strided_slice %9 {offsets = [0, 0], sizes = [64, 128], strides = [1, 1]} : vector<64x384xbf16> to vector<64x128xbf16>
    %c0_8 = arith.constant 0 : index
    %c0_9 = arith.constant 0 : index
    %c0_10 = arith.constant 0 : index
    %c0_11 = arith.constant 0 : index
    %11 = vector.load %arg6[%c0_8, %c0_9, %c0_10, %c0_11] : memref<1x1x64x128xbf16, #tpu.memory_space<vmem>>, vector<1x1x64x128xbf16>
    %12 = vector.shape_cast %11 : vector<1x1x64x128xbf16> to vector<64x128xbf16>
    %13 = vector.shape_cast %10 : vector<64x128xbf16> to vector<1x1x64x128xbf16>
    tpu.vector_store %arg6[%c0_8, %c0_9, %c0_10, %c0_11], %13 {strides = array<i32>} : memref<1x1x64x128xbf16, #tpu.memory_space<vmem>>, vector<1x1x64x128xbf16>,
    %14 = vector.extract_strided_slice %9 {offsets = [0, 128], sizes = [64, 128], strides = [1, 1]} : vector<64x384xbf16> to vector<64x128xbf16>
    %c0_12 = arith.constant 0 : index
    %c0_13 = arith.constant 0 : index
    %c0_14 = arith.constant 0 : index
    %c0_15 = arith.constant 0 : index
    %15 = vector.load %arg7[%c0_12, %c0_13, %c0_14, %c0_15] : memref<1x1x64x128xbf16, #tpu.memory_space<vmem>>, vector<1x1x64x128xbf16>
    %16 = vector.shape_cast %15 : vector<1x1x64x128xbf16> to vector<64x128xbf16>
    %17 = vector.shape_cast %14 : vector<64x128xbf16> to vector<1x1x64x128xbf16>
    tpu.vector_store %arg7[%c0_12, %c0_13, %c0_14, %c0_15], %17 {strides = array<i32>} : memref<1x1x64x128xbf16, #tpu.memory_space<vmem>>, vector<1x1x64x128xbf16>,
    %18 = vector.extract_strided_slice %9 {offsets = [0, 256], sizes = [64, 128], strides = [1, 1]} : vector<64x384xbf16> to vector<64x128xbf16>
    %c0_16 = arith.constant 0 : index
    %c0_17 = arith.constant 0 : index
    %c0_18 = arith.constant 0 : index
    %c0_19 = arith.constant 0 : index
    %19 = vector.load %arg8[%c0_16, %c0_17, %c0_18, %c0_19] : memref<1x1x64x128xbf16, #tpu.memory_space<vmem>>, vector<1x1x64x128xbf16>
    %20 = vector.shape_cast %19 : vector<1x1x64x128xbf16> to vector<64x128xbf16>
    %21 = vector.shape_cast %18 : vector<64x128xbf16> to vector<1x1x64x128xbf16>
    tpu.vector_store %arg8[%c0_16, %c0_17, %c0_18, %c0_19], %21 {strides = array<i32>} : memref<1x1x64x128xbf16, #tpu.memory_space<vmem>>, vector<1x1x64x128xbf16>,
    return
  }
  func.func @transform_0(%arg0: i32, %arg1: i32, %arg2: i32) -> (i32, i32, i32) {
    %c0_i32 = arith.constant 0 : i32
    %c0_i32_0 = arith.constant 0 : i32
    return %arg0, %arg1, %c0_i32 : i32, i32, i32
  }
  func.func @transform_1(%arg0: i32, %arg1: i32, %arg2: i32) -> (i32, i32, i32) {
    %c0_i32 = arith.constant 0 : i32
    %c0_i32_0 = arith.constant 0 : i32
    %c0_i32_1 = arith.constant 0 : i32
    return %arg2, %c0_i32, %c0_i32_0 : i32, i32, i32
  }
  func.func @transform_2(%arg0: i32, %arg1: i32, %arg2: i32) -> (i32, i32, i32) {
    %c0_i32 = arith.constant 0 : i32
    %c0_i32_0 = arith.constant 0 : i32
    %c0_i32_1 = arith.constant 0 : i32
    return %arg2, %c0_i32, %c0_i32_0 : i32, i32, i32
  }
  func.func @transform_3(%arg0: i32, %arg1: i32, %arg2: i32) -> (i32, i32, i32, i32) {
    %c0_i32 = arith.constant 0 : i32
    %c0_i32_0 = arith.constant 0 : i32
    return %arg0, %arg2, %arg1, %c0_i32 : i32, i32, i32, i32
  }
  func.func @transform_4(%arg0: i32, %arg1: i32, %arg2: i32) -> (i32, i32, i32, i32) {
    %c0_i32 = arith.constant 0 : i32
    %c0_i32_0 = arith.constant 0 : i32
    return %arg0, %arg2, %arg1, %c0_i32 : i32, i32, i32, i32
  }
  func.func @transform_5(%arg0: i32, %arg1: i32, %arg2: i32) -> (i32, i32, i32, i32) {
    %c0_i32 = arith.constant 0 : i32
    %c0_i32_0 = arith.constant 0 : i32
    return %arg0, %arg2, %arg1, %c0_i32 : i32, i32, i32, i32
  }
}

</mosaic_0001>

<bundles_post_ra>
// kernel: tpu_custom_call.1
= control target key start
LH: loop header
LB: loop body
LE: loop exit
PB: predicated region body
PF: predicated region fallthrough
CT: control target
= control target key end

     0   :  { %s2744_s0 = inlined_call_operand.hbm [shape: bf16[2,128,256], index: 0, kind: input, shape index: {}]   ;;  %s2745_s1 = inlined_call_operand.hbm [shape: bf16[4,256,384], index: 1, kind: input, shape index: {}]   ;;  %s2746_s2 = inlined_call_operand.hbm [shape: f32[4,1,384], index: 2, kind: input, shape index: {}]   ;;  %s2747_s3 = inlined_call_operand.hbm [shape: bf16[2,4,128,128], index: 3, kind: output, shape index: {0}]   ;;  %s2748_s4 = inlined_call_operand.hbm [shape: bf16[2,4,128,128], index: 4, kind: output, shape index: {1}]   ;;  %s2749_s5 = inlined_call_operand.hbm [shape: bf16[2,4,128,128], index: 5, kind: output, shape index: {2}]  }
   0x1   :  { %2785 = sst [smem:[#allocation35_spill]] %s2744_s0 }
   0x2   :  { %2786 = sst [smem:[#allocation36_spill]] %s2745_s1 }
   0x3   :  { %2787 = sst [smem:[#allocation37_spill]] %s2746_s2 }
   0x4   :  { %2788 = sst [smem:[#allocation38_spill]] %s2747_s3 }
   0x5   :  { %2789 = sst [smem:[#allocation39_spill]] %s2748_s4 }
   0x6   :  { %2790 = sst [smem:[#allocation40_spill]] %s2749_s5 }
   0x7   :  { %11 = vsyncpa [#allocation3], 0 }
   0x8   :  { %13 = vsyncpa [#allocation3 + $0x1], 0 }
   0x9   :  { %14 = vsyncpa [#allocation6], 0 }
   0xa   :  { %16 = vsyncpa [#allocation6 + $0x1], 0 }
   0xb   :  { %17 = vsyncpa [#allocation4], 0 }
   0xc   :  { %19 = vsyncpa [#allocation4 + $0x1], 0 }
   0xd   :  { %20 = vsyncpa [#allocation10], 0 }
   0xe   :  { %22 = vsyncpa [#allocation10 + $0x1], 0  ;;  %s2157_s18 = smov 0   ;;  %s2159_s19 = smov 0  }
   0xf   :  { %s2161_s20 = smov 0   ;;  %s2163_s21 = smov 0  }
  0x10   :  { %s2165_s22 = smov 0   ;;  %s2167_s23 = smov 0  }
  0x11   :  { %s2169_s24 = smov 0   ;;  %s2171_s25 = smov 0  }
  0x12   :  { %s2173_s26 = smov 0   ;;  %s2175_s27 = smov 0  }
  0x13   :  { %s2177_s28 = smov 0   ;;  %s2179_s29 = smov 0  }
  0x14   :  { %s2181_s30 = smov 0   ;;  %s2183_s6 = smov 0  }
  0x15   :  { %s2185_s7 = smov 0   ;;  %s2187_s8 = smov 0  }
  0x16 LB: > { %2791 = sst [smem:[#allocation16_spill]] %s2053_s18  ;;  %s2236_s9 = sadd.s32 4294967295, %s2113_s8   ;;  %s2113_s8 = sphi %s2187_s8, %s28_s8   ;;  %s2109_s7 = sphi %s2185_s7, %s2878_s7   ;;  %s2105_s6 = sphi %s2183_s6, %s2877_s6   ;;  %s2101_s30 = sphi %s2181_s30, %s2876_s30   ;;  %s2097_s29 = sphi %s2179_s29, %s2862_s29   ;;  %s2093_s28 = sphi %s2177_s28, %s2875_s28   ;;  %s2089_s27 = sphi %s2175_s27, %s2874_s27   ;;  %s2085_s26 = sphi %s2173_s26, %s2873_s26   ;;  %s2081_s25 = sphi %s2171_s25, %s2872_s25   ;;  %s2077_s24 = sphi %s2169_s24, %s2871_s24   ;;  %s2073_s23 = sphi %s2167_s23, %s2870_s23   ;;  %s2069_s22 = sphi %s2165_s22, %s2869_s22   ;;  %s2065_s21 = sphi %s2163_s21, %s2858_s21   ;;  %s2061_s20 = sphi %s2161_s20, %s2868_s20   ;;  %s2057_s19 = sphi %s2159_s19, %s2867_s19   ;;  %s2053_s18 = sphi %s2157_s18, %s2866_s18  }
  0x17   : > { %2792 = sst [smem:[#allocation17_spill]] %s2057_s19  ;;  %s40_s10 = sadd.s32 1, %s2101_s30 }
  0x18   : > { %2793 = sst [smem:[#allocation18_spill]] %s2069_s22  ;;  %p2239_p0 = scmp.ge.s32.totalorder %s40_s10, 4 }
  0x19   : > { %2794 = sst [smem:[#allocation19_spill]] %s2081_s25  ;;  %p2759_p1 = scmp.eq.s32.totalorder %s2113_s8, 0 }
  0x1a   : > { %2795 = sst [smem:[#allocation20_spill]] %s2089_s27  ;;  %p2758_p2 = scmp.eq.s32.totalorder %s2236_s9, 0 }
  0x1b   : > { %2796 = sst [smem:[#allocation21_spill]] %s2093_s28  ;;  %s82_s12 = sadd.s32 1, %s2073_s23 }
  0x1c   : > { %2797 = sst [smem:[#allocation22_spill]] %s2097_s29  ;;  %s2880_s10 = smov (%p2239_p0, %s40_s10), 0 }
  0x1d   : > { %2798 = sst [smem:[#allocation23_spill]] %s2109_s7  ;;  %p89_p3 = scmp.ne.s32.totalorder %s2073_s23, %s2069_s22 }
  0x1e   : > { %2799 = sst [smem:[#allocation24_spill]] %s2236_s9  ;;  %p95_p4 = scmp.ne.s32.totalorder %s2069_s22, %s2065_s21 }
  0x1f   : > { %2801 = sst [smem:[#allocation25_spill]] %s2880_s10  ;;  %s2255_s13 = ssub.s32 %s2101_s30, %s2880_s10 }
  0x20   : > { %p80_p6 = scmp.eq.s32.totalorder %s2255_s13, 0  ;;  %p91_p7 = por %p89_p3, %p2759_p1 }
  0x21   : > { %p2263_p8 = por %p95_p4, %p2758_p2  ;;  %p2757_p9 = scmp.lt.s32.totalorder %s2113_s8, 16 }
  0x22   : > { %s2268_s15 = scalar_select %p80_p6, %s2073_s23, %s82_s12  }
  0x23   : > { %s2802_s14 = scalar_select %p2263_p8, 1, 0 }
  0x24   : > { %2804 = sst [smem:[#allocation27_spill]] %s2268_s15  ;;  %s259_s16 = sand.u32 1, %s2113_s8  }
  0x25   : > { %2803 = sst [smem:[#allocation26_spill]] %s2802_s14  ;;  %s2754_s17 = sand.u32 1, %s2073_s23  }
  0x26   : > { %s1547_s5 = smul.u32 384, %s2754_s17  ;;  %p2277_p10 = pnand %p2757_p9, %p91_p7 }
  0x27   : > { %s1548_s10 = smul.u32 6144, %s2101_s30  ;;  %s2806_s1 = sld [smem:[#allocation36_spill]] }
  0x28   : > { %s263_s12 = scalar_lea.vmem [#allocation5], %s1547_s5  ;;  %s2289_s17 = scalar_lea.sflag [#allocation6], %s259_s16 }
  0x29   : > { %s270_s15 = sshll.u32 %s263_s12, 4  ;;  %2807 = sst [smem:[#allocation28_spill]] %s2289_s17  ;;  %s2287_s15 = int_to_ptr.vmem [resolvable:$true] %s270_s15 }
  0x2a   : > { %p2779_p12 = pneg %p2277_p10 }
  0x2d   : > { %s2285_s29 = scalar_lea.hbm %s2806_s1, %s1548_s10  ;;  %s1802_s10 = scalar_lea.hbm %s2806_s1, 24576 }
  0x2e   : > { %s1797_s27 = scalar_lea.hbm %s2285_s29, 6144  ;;  %p1803_p4 = scmp.lt.u32.totalorder %s2285_s29, %s2806_s1 }
  0x2f   : > { %p1798_p11 = scmp.ne.s32.totalorder %s2285_s29, %s1797_s27  ;;  %p1804_p6 = scmp.lt.u32.totalorder %s1802_s10, %s1797_s27 }
  0x30   : > { %p1806_p9 = scmp.lt.u32.totalorder %s1797_s27, %s2285_s29 }
  0x31   : > { %p1800_p13 = pnand %p2779_p12, %p1798_p11  ;;  %p1805_p7 = por %p1804_p6, %p1803_p4 }
  0x33   : > { %p1801_p3 = pneg %p1800_p13  ;;  %p1807_p5 = por %p1806_p9, %p1805_p7 }
  0x35   : > { %p1808_p2 = pnand %p1807_p5, %p1801_p3 }
  0x37   : > { %1811 = shalt.err (!%p1808_p2)
}
  0x38   : > { %s1812_s5 = scalar_lea.vmem %s2287_s15, 6144  ;;  %s2115_s16 = smov [#allocation5]  }
  0x39   : > { %p1813_p11 = scmp.ne.s32.totalorder %s2287_s15, %s1812_s5  ;;  %s1817_s12 = sshll.u32 %s2115_s16, 4  ;;  %s1818_s12 = int_to_ptr.vmem [resolvable:$false] %s1817_s12 }
  0x3a   : > { %s1819_s28 = scalar_lea.vmem %s1818_s12, 12288  ;;  %p1820_p8 = scmp.lt.s32.totalorder %s2287_s15, %s1818_s12 }
  0x3b   : > { %p1815_p13 = pnand %p1813_p11, %p2779_p12  ;;  %p1821_p4 = scmp.lt.s32.totalorder %s1819_s28, %s1812_s5 }
  0x3d   : > { %p1816_p1 = pneg %p1815_p13  ;;  %p1822_p6 = por %p1821_p4, %p1820_p8 }
  0x3f   : > { %p1823_p9 = pnand %p1822_p6, %p1816_p1 }
  0x41   : > { %1826 = shalt.err (!%p1823_p9)
}
  0x42   : > { %s2116_s27 = smov 192   ;;  %s2117_s14 = smov 12  }
  0x43   : > { %1571 = dma.hbm_to_vmem [thread:$0]  (!%p2277_p10), %s2285_s29, 6144, %s2287_s15, %s2289_s17, %s2116_s27, %s2116_s27, %s2117_s14  }
  0x44   : > { %p1311_p1 = scmp.ge.s32.totalorder %s2113_s8, 1  ;;  %p297_p2 = scmp.lt.s32.totalorder %s2113_s8, 17 }
  0x45   : > { %s2762_s4 = sadd.s32 4294967294, %s2113_s8   ;;  %s43_s10 = sadd.s32 1, %s2105_s6 }
  0x46   : > { %p2319_p5 = pnand %p1311_p1, %p297_p2  ;;  %s47_s5 = sadd.s32 1, %s2109_s7 }
  0x47   : > { %s2882_s10 = smov (!%p2239_p0, %s43_s10), %s2105_s6  ;;  %s56_s29 = sadd.s32 1, %s2085_s26 }
  0x48   : > { %s2808_s3 = scalar_select %p2319_p5, 1, 0 }
  0x49   : > { %p63_p8 = scmp.ne.s32.totalorder %s2085_s26, %s2081_s25  ;;  %p45_p3 = scmp.ge.s32.totalorder %s2882_s10, 2 }
  0x4a   : > { %2809 = sst [smem:[#allocation29_spill]] %s2808_s3  ;;  %p69_p7 = scmp.ne.s32.totalorder %s2081_s25, %s2077_s24 }
  0x4b   : > { %p2810_p11 = scmp.eq.s32.totalorder %s2113_s8, 0  ;;  %s138_s16 = sadd.s32 1, %s2061_s20 }
  0x4c   : > { %s2884_s10 = smov (%p45_p3, %s2882_s10), 0  ;;  %s2886_s5 = smov (!%p45_p3, %s47_s5), %s2109_s7 }
  0x4d   : > { %p2336_p13 = por %p2810_p11, %p63_p8  ;;  %2812 = sst [smem:[#allocation30_spill]] %s2884_s10 }
  0x4e   : > { %s52_s11 = ssub.s32 %s2105_s6, %s2884_s10  ;;  %p2813_p0 = scmp.eq.s32.totalorder %s2236_s9, 0 }
  0x4f   : > { %p49_p6 = scmp.ge.s32.totalorder %s2886_s5, 2  ;;  %p148_p9 = scmp.ne.s32.totalorder %s2061_s20, %s2057_s19 }
  0x50   : > { %p2348_p4 = por %p2813_p0, %p69_p7  ;;  %p154_p1 = scmp.ne.s32.totalorder %s2057_s19, %s2053_s18 }
  0x51   : > { %p155_p2 = scmp.eq.s32.totalorder %s2762_s4, 15  ;;  %s2888_s5 = smov (%p49_p6, %s2886_s5), 0 }
  0x52   : > { %s2814_s12 = scalar_select %p2348_p4, 1, 0 }
  0x53   : > { %2816 = sst [smem:[#allocation32_spill]] %s2888_s5  ;;  %p2817_p8 = scmp.eq.s32.totalorder %s2236_s9, 15 }
  0x54   : > { %2815 = sst [smem:[#allocation31_spill]] %s2814_s12  ;;  %p2366_p7 = por %p155_p2, %p154_p1 }
  0x55   : > { %p2362_p3 = por %p2817_p8, %p148_p9  ;;  %s51_s27 = ssub.s32 %s2109_s7, %s2888_s5 }
  0x56   : > { %s2820_s28 = scalar_select %p2366_p7, 1, 0 }
  0x57   : > { %s2818_s24 = scalar_select %p2362_p3, 1, 0 }
  0x58   : > { %2821 = sst [smem:[#allocation34_spill]] %s2820_s28  ;;  %s235_s14 = sand.u32 1, %s2085_s26  }
  0x59   : > { %2819 = sst [smem:[#allocation33_spill]] %s2818_s24  ;;  %s53_s1 = sor.u32 %s52_s11, %s51_s27 }
  0x5a   : > { %s133_s10 = sor.u32 %s2255_s13, %s51_s27  ;;  %p54_p11 = scmp.eq.s32.totalorder %s53_s1, 0 }
  0x5b   : > { %s135_s4 = sor.u32 %s133_s10, %s52_s11  ;;  %s1304_s22 = sshll.u32 %s235_s14, 6 }
  0x5c   : > { %p136_p0 = scmp.eq.s32.totalorder %s135_s4, 0  ;;  %s1413_s24 = sshll.u32 %s2105_s6, 4 }
  0x5d   : > { %s2375_s18 = scalar_select %p54_p11, %s2085_s26, %s56_s29  }
  0x5e   : > { %s2378_s19 = scalar_select %p136_p0, %s2061_s20, %s138_s16  }
  0x5f   : > { %s1307_s9 = sshll.u32 %s2109_s7, 5  ;;  %s239_s25 = scalar_lea.vmem [#allocation2], %s1304_s22 }
  0x60   : > { %s246_s12 = sadd.s32 %s1413_s24, %s1307_s9  ;;  %s249_s28 = sshll.u32 %s239_s25, 4  ;;  %s2382_s28 = int_to_ptr.vmem [resolvable:$true] %s249_s28 }
  0x61   : > { %s1308_s5 = sshll.u32 %s246_s12, 6  ;;  %s2822_s0 = sld [smem:[#allocation35_spill]] }
  0x62   : > { %p2823_p6 = scmp.lt.s32.totalorder %s2113_s8, 16  ;;  %s2825_s22 = sand.u32 1, %s2073_s23  }
  0x63   : > { %s2399_s25 = smul.u32 3, %s2825_s22  ;;  %s2401_s9 = scalar_lea.sflag [#allocation3], %s235_s14 }
  0x64   : > { %p2393_p9 = pnand %p2823_p6, %p2336_p13 }
  0x66   : > { %p1829_p2 = pneg %p2393_p9 }
  0x67   : > { %s2387_s13 = scalar_lea.hbm %s2822_s0, %s1308_s5  ;;  %s1832_s10 = scalar_lea.hbm %s2822_s0, 4096 }
  0x68   : > { %s1827_s17 = scalar_lea.hbm %s2387_s13, 1024  ;;  %p1833_p13 = scmp.lt.u32.totalorder %s2387_s13, %s2822_s0 }
  0x69   : > { %p1828_p1 = scmp.ne.s32.totalorder %s2387_s13, %s1827_s17  ;;  %p1834_p0 = scmp.lt.u32.totalorder %s1832_s10, %s1827_s17 }
  0x6a   : > { %p1836_p12 = scmp.lt.u32.totalorder %s1827_s17, %s2387_s13 }
  0x6b   : > { %p1830_p8 = pnand %p1829_p2, %p1828_p1  ;;  %p1835_p6 = por %p1834_p0, %p1833_p13 }
  0x6d   : > { %p1831_p11 = pneg %p1830_p8  ;;  %p1837_p7 = por %p1836_p12, %p1835_p6 }
  0x6f   : > { %p1838_p3 = pnand %p1837_p7, %p1831_p11 }
  0x71   : > { %1841 = shalt.err (!%p1838_p3)
}
  0x72   : > { %s1842_s15 = scalar_lea.vmem %s2382_s28, 1024  ;;  %s2118_s16 = smov [#allocation2]  }
  0x73   : > { %p1843_p1 = scmp.ne.s32.totalorder %s2382_s28, %s1842_s15  ;;  %s1847_s11 = sshll.u32 %s2118_s16, 4  ;;  %s1848_s11 = int_to_ptr.vmem [resolvable:$false] %s1847_s11 }
  0x74   : > { %s1849_s12 = scalar_lea.vmem %s1848_s11, 2048  ;;  %p1850_p5 = scmp.lt.s32.totalorder %s2382_s28, %s1848_s11 }
  0x75   : > { %p1845_p8 = pnand %p1843_p1, %p1829_p2  ;;  %p1851_p13 = scmp.lt.s32.totalorder %s1849_s12, %s1842_s15 }
  0x77   : > { %p1846_p4 = pneg %p1845_p8  ;;  %p1852_p0 = por %p1851_p13, %p1850_p5 }
  0x79   : > { %p1853_p12 = pnand %p1852_p0, %p1846_p4 }
  0x7b   : > { %1856 = shalt.err (!%p1853_p12)
}
  0x7c   : > { %s2119_s24 = smov 128   ;;  %s2120_s27 = smov 8  }
  0x7d   : > { %1568 = dma.hbm_to_vmem [thread:$0]  (!%p2393_p9), %s2387_s13, 1024, %s2382_s28, %s2401_s9, %s2119_s24, %s2119_s24, %s2120_s27  }
  0x7e   : > { %s1550_s14 = smul.u32 48, %s2101_s30  ;;  %s284_s22 = scalar_lea.vmem [#allocation7], %s2399_s25 }
  0x7f   : > { %s292_s17 = sshll.u32 %s284_s22, 4  ;;  %s2826_s2 = sld [smem:[#allocation37_spill]]  ;;  %s293_s17 = int_to_ptr.vmem [resolvable:$true] %s292_s17 }
  0x80   : > { %p2827_p4 = pneg %p2277_p10 }
  0x85   : > { %s290_s10 = scalar_lea.hbm %s2826_s2, %s1550_s14  ;;  %s1862_s16 = scalar_lea.hbm %s2826_s2, 192 }
  0x86   : > { %s1857_s5 = scalar_lea.hbm %s290_s10, 48  ;;  %p1863_p9 = scmp.lt.u32.totalorder %s290_s10, %s2826_s2 }
  0x87   : > { %p1858_p5 = scmp.ne.s32.totalorder %s290_s10, %s1857_s5  ;;  %p1864_p2 = scmp.lt.u32.totalorder %s1862_s16, %s1857_s5 }
  0x88   : > { %p1866_p6 = scmp.lt.u32.totalorder %s1857_s5, %s290_s10 }
  0x89   : > { %p1860_p3 = pnand %p1858_p5, %p2827_p4  ;;  %p1865_p11 = por %p1864_p2, %p1863_p9 }
  0x8b   : > { %p1861_p7 = pneg %p1860_p3  ;;  %p1867_p1 = por %p1866_p6, %p1865_p11 }
  0x8d   : > { %p1868_p8 = pnand %p1867_p1, %p1861_p7 }
  0x8f   : > { %1871 = shalt.err (!%p1868_p8)
}
  0x90   : > { %s1872_s13 = scalar_lea.vmem %s293_s17, 48  ;;  %p2828_p0 = pmov %p2827_p4 }
  0x91   : > { %p1873_p13 = scmp.ne.s32.totalorder %s293_s17, %s1872_s13  ;;  %s2121_s25 = smov [#allocation7]  }
  0x92   : > { %s1877_s9 = sshll.u32 %s2121_s25, 4  ;;  %s1878_s9 = int_to_ptr.vmem [resolvable:$false] %s1877_s9 }
  0x93   : > { %p1875_p12 = pnand %p1873_p13, %p2828_p0  ;;  %s1879_s11 = scalar_lea.vmem %s1878_s9, 96 }
  0x94   : > { %p1880_p4 = scmp.lt.s32.totalorder %s293_s17, %s1878_s9  ;;  %p1881_p3 = scmp.lt.s32.totalorder %s1879_s11, %s1872_s13 }
  0x95   : > { %p1876_p5 = pneg %p1875_p12 }
  0x96   : > { %p1882_p2 = por %p1881_p3, %p1880_p4 }
  0x98   : > { %p1883_p9 = pnand %p1882_p2, %p1876_p5 }
  0x9a   : > { %1886 = shalt.err (!%p1883_p9)
}
  0x9b   : > { %s2829_s12 = sld [smem:[#allocation28_spill]]  ;;  %s2830_s24 = sld [smem:[#allocation29_spill]] }
  0xa1   : > { %1574 = dma.hbm_to_vmem [thread:$0]  (!%p2277_p10), %s290_s10, 48, %s293_s17, %s2829_s12  }
  0xa2   : > { %p2831_p7 = scmp.ne.s32.totalorder %s2830_s24, 0 }
  0xa3   : > { %s2832_s27 = sld [smem:[#allocation19_spill]] (!%p2831_p7)  ;;  %s2833_s14 = sld [smem:[#allocation31_spill]] (!%p2831_p7) }
  0xa4   : > { %301 = sbr.rel (%p2831_p7) target bundleno = 553 (0x229), region = 32 }
  0xa9   : > { %s303_s22 = sand.u32 (!%p2831_p7), 1, %s2832_s27   ;;  %p2834_p11 = scmp.ne.s32.totalorder (!%p2831_p7), %s2833_s14, 0 }
  0xaa   : > { %s1312_s3 = sshll.u32 (!%p2831_p7), %s303_s22, 6  ;;  %s304_s4 = scalar_lea.sflag (!%p2831_p7), [#allocation3], %s303_s22 }
  0xab   : > { %s2452_s5 = scalar_lea.vmem [#allocation2], %s1312_s3 }
  0xac   : > { %2036 = dma.done.wait (%p2834_p11), %s304_s4, 1024  }
  0xad   : > { %2038 = vsyncadd (%p2834_p11), %s304_s4, 4294966272  ;;  %s2835_s29 = sld [smem:[#allocation24_spill]]  ;;  %s2836_s15 = sld [smem:[#allocation18_spill]] }
  0xae   : > { %s2837_s21 = sld [smem:[#allocation26_spill]] }
  0xb3   : > { %s2782_s17 = sand.u32 1, %s2835_s29   ;;  %s314_s10 = sand.u32 1, %s2836_s15  }
  0xb4   : > { %s1551_s16 = smul.u32 384, %s314_s10  ;;  %s313_s1 = scalar_lea.sflag [#allocation6], %s2782_s17 }
  0xb5   : > { %p2838_p10 = scmp.ne.s32.totalorder %s2837_s21, 0 }
  0xb6   : > { %s2464_s28 = scalar_lea.vmem [#allocation5], %s1551_s16 }
  0xb7   : > { %2040 = dma.done.wait (%p2838_p10), %s313_s1, 6192  }
  0xb8   : > { %2042 = vsyncadd (%p2838_p10), %s313_s1, 4294961104  ;;  %v1721_v0 = vld [vmem:[%s2464_s28 + $0x4] ss:$12 sps:$4 sm:$0xff]   ;;  %v1723_v1 = vld [vmem:[%s2464_s28] ss:$12 sps:$4 sm:$0xff]   ;;  %s2839_s13 = sld [smem:[#allocation17_spill]]  ;;  %v451_v56 = vlaneseq }
  0xb9   : > { %762 = vmatprep.subr.bf16.mxu0 %v1721_v0  ;;  %v1724_v2 = vld [vmem:[%s2464_s28 + $0x1c] ss:$12 sps:$4 sm:$0xff]   ;;  %v1726_v3 = vld [vmem:[%s2464_s28 + $0x18] ss:$12 sps:$4 sm:$0xff]   ;;  %v1727_v4 = vld [vmem:[%s2464_s28 + $0x34] ss:$12 sps:$4 sm:$0xff]  }
  0xba   : > { %763 = vmatpush1.bf16.msra.mxu0 %v1723_v1  ;;  %v1729_v5 = vld [vmem:[%s2464_s28 + $0x30] ss:$12 sps:$4 sm:$0xff]   ;;  %v1730_v6 = vld [vmem:[%s2464_s28 + $0x4c] ss:$12 sps:$4 sm:$0xff]   ;;  %v1732_v7 = vld [vmem:[%s2464_s28 + $0x48] ss:$12 sps:$4 sm:$0xff]  }
  0xbb   : > { %764 = vmatprep.subr.bf16.mxu0 %v1724_v2  ;;  %v1733_v8 = vld [vmem:[%s2464_s28 + $0x64] ss:$12 sps:$4 sm:$0xff]   ;;  %v1744_v9 = vld [vmem:[%s2464_s28 + $0xc8] ss:$12 sps:$4 sm:$0xff]   ;;  %v1735_v11 = vld [vmem:[%s2464_s28 + $0x60] ss:$12 sps:$4 sm:$0xff]  }
  0xbc   : > { %v1746_v10 = vld [vmem:[%s2464_s28 + $0x8] ss:$12 sps:$4 sm:$0xff]   ;;  %1507 = vmatprep.subr.bf16.mxu1 %v1744_v9  ;;  %v1749_v12 = vld [vmem:[%s2464_s28 + $0xe0] ss:$12 sps:$4 sm:$0xff]   ;;  %v1754_v15 = vld [vmem:[%s2464_s28 + $0xf8] ss:$12 sps:$4 sm:$0xff]  }
  0xbd   : > { %1508 = vmatpush3.bf16.msra.mxu1 %v1746_v10  ;;  %v1751_v13 = vld [vmem:[%s2464_s28 + $0x20] ss:$12 sps:$4 sm:$0xff]   ;;  %v1736_v14 = vld [vmem:[%s2464_s28 + $0x7c] ss:$12 sps:$4 sm:$0xff]   ;;  %v1738_v16 = vld [vmem:[%s2464_s28 + $0x78] ss:$12 sps:$4 sm:$0xff]  }
  0xbe   : > { %765 = vmatpush1.bf16.msra.mxu0 %v1726_v3  ;;  %1509 = vmatprep.subr.bf16.mxu1 %v1749_v12  ;;  %v1756_v17 = vld [vmem:[%s2464_s28 + $0x38] ss:$12 sps:$4 sm:$0xff]   ;;  %v1739_v18 = vld [vmem:[%s2464_s28 + $0x94] ss:$12 sps:$4 sm:$0xff]   ;;  %v1759_v19 = vld [vmem:[%s2464_s28 + $0x110] ss:$12 sps:$4 sm:$0xff]  }
  0xbf   : > { %766 = vmatprep.subr.bf16.mxu0 %v1727_v4  ;;  %v1761_v20 = vld [vmem:[%s2464_s28 + $0x50] ss:$12 sps:$4 sm:$0xff]   ;;  %v1742_v22 = vld [vmem:[%s2464_s28 + $0xac] ss:$12 sps:$4 sm:$0xff]   ;;  %v1764_v23 = vld [vmem:[%s2464_s28 + $0x128] ss:$12 sps:$4 sm:$0xff]  }
  0xc0   : > { %v1741_v21 = vld [vmem:[%s2464_s28 + $0x90] ss:$12 sps:$4 sm:$0xff]   ;;  %v1745_v24 = vld [vmem:[%s2464_s28 + $0xa8] ss:$12 sps:$4 sm:$0xff]   ;;  %v1769_v26 = vld [vmem:[%s2464_s28 + $0x140] ss:$12 sps:$4 sm:$0xff]  }
  0xc1   : > { %1510 = vmatpush3.bf16.msra.mxu1 %v1751_v13  ;;  %v1766_v25 = vld [vmem:[%s2464_s28 + $0x68] ss:$12 sps:$4 sm:$0xff]   ;;  %v1747_v27 = vld [vmem:[%s2464_s28 + $0xc4] ss:$12 sps:$4 sm:$0xff]   ;;  %v1771_v28 = vld [vmem:[%s2464_s28 + $0x80] ss:$12 sps:$4 sm:$0xff]  }
  0xc2   : > { %767 = vmatpush1.bf16.msra.mxu0 %v1729_v5  ;;  %1511 = vmatprep.subr.bf16.mxu1 %v1754_v15  ;;  %v1750_v29 = vld [vmem:[%s2464_s28 + $0xc0] ss:$12 sps:$4 sm:$0xff]   ;;  %v1774_v30 = vld [vmem:[%s2464_s28 + $0x158] ss:$12 sps:$4 sm:$0xff]   ;;  %v1752_v31 = vld [vmem:[%s2464_s28 + $0xdc] ss:$12 sps:$4 sm:$0xff]  }
  0xc3   : > { %768 = vmatprep.subr.bf16.mxu0 %v1730_v6  ;;  %v1755_v32 = vld [vmem:[%s2464_s28 + $0xd8] ss:$12 sps:$4 sm:$0xff]   ;;  %v1779_v34 = vld [vmem:[%s2464_s28 + $0x170] ss:$12 sps:$4 sm:$0xff]   ;;  %v1757_v35 = vld [vmem:[%s2464_s28 + $0xf4] ss:$12 sps:$4 sm:$0xff]  }
  0xc4   : > { %v1776_v33 = vld [vmem:[%s2464_s28 + $0x98] ss:$12 sps:$4 sm:$0xff]   ;;  %v1781_v37 = vld [vmem:[%s2464_s28 + $0xb0] ss:$12 sps:$4 sm:$0xff]   ;;  %v1782_v40 = vld [vmem:[%s2452_s5] ss:$8 sps:$4 sm:$0xff]  }
  0xc5   : > { %1512 = vmatpush3.bf16.msra.mxu1 %v1756_v17  ;;  %v1784_v36 = vld [vmem:[%s2452_s5 + $0x4] ss:$8 sps:$4 sm:$0xff]   ;;  %v1760_v38 = vld [vmem:[%s2464_s28 + $0xf0] ss:$12 sps:$4 sm:$0xff]   ;;  %v1765_v42 = vld [vmem:[%s2464_s28 + $0x108] ss:$12 sps:$4 sm:$0xff]  }
  0xc6   : > { %769 = vmatpush1.bf16.msra.mxu0 %v1732_v7  ;;  %1513 = vmatprep.subr.bf16.mxu1 %v1759_v19  ;;  %v1762_v39 = vld [vmem:[%s2464_s28 + $0x10c] ss:$12 sps:$4 sm:$0xff]   ;;  %v1788_v41 = vld [vmem:[%s2452_s5 + $0x14] ss:$8 sps:$4 sm:$0xff]   ;;  %v1767_v43 = vld [vmem:[%s2464_s28 + $0x124] ss:$12 sps:$4 sm:$0xff]  }
  0xc7   : > { %770 = vmatprep.subr.bf16.mxu0 %v1733_v8  ;;  %867 = vmatprep.mubr.bf16.mxu1 %v1784_v36  ;;  %v1770_v44 = vld [vmem:[%s2464_s28 + $0x120] ss:$12 sps:$4 sm:$0xff]   ;;  %v1772_v45 = vld [vmem:[%s2464_s28 + $0x13c] ss:$12 sps:$4 sm:$0xff]   ;;  %v1790_v46 = vld [vmem:[%s2452_s5 + $0x10] ss:$8 sps:$4 sm:$0xff]  }
  0xc8   : > { %794 = vmatprep.mubr.bf16.mxu0 %v1784_v36  ;;  %v1791_v47 = vld [vmem:[%s2452_s5 + $0x24] ss:$8 sps:$4 sm:$0xff]   ;;  %v1777_v49 = vld [vmem:[%s2464_s28 + $0x154] ss:$12 sps:$4 sm:$0xff]   ;;  %v1780_v50 = vld [vmem:[%s2464_s28 + $0x150] ss:$12 sps:$4 sm:$0xff]  }
  0xc9   : > { %1514 = vmatpush3.bf16.msra.mxu1 %v1761_v20  ;;  %v1775_v48 = vld [vmem:[%s2464_s28 + $0x138] ss:$12 sps:$4 sm:$0xff]   ;;  %v1793_v52 = vld [vmem:[%s2452_s5 + $0x20] ss:$8 sps:$4 sm:$0xff]   ;;  %v1794_v53 = vld [vmem:[%s2452_s5 + $0x34] ss:$8 sps:$4 sm:$0xff]  }
  0xca   : > { %771 = vmatpush1.bf16.msra.mxu0 %v1735_v11  ;;  %1515 = vmatprep.subr.bf16.mxu1 %v1764_v23  ;;  %v1785_v51 = vld [vmem:[%s2464_s28 + $0x16c] ss:$12 sps:$4 sm:$0xff]   ;;  %v1787_v54 = vld [vmem:[%s2464_s28 + $0x168] ss:$12 sps:$4 sm:$0xff]   ;;  %s1552_s25 = smul.u32 3, %s314_s10  ;;  %v452_v57 = vshrl.u32 %v451_v56, 7 }
  0xcb   : > { %772 = vmatprep.subr.bf16.mxu0 %v1736_v14  ;;  %v1796_v55 = vld [vmem:[%s2452_s5 + $0x30] ss:$8 sps:$4 sm:$0xff]   ;;  %s2783_s11 = sand.u32 1, %s2839_s13   ;;  %s2840_s22 = sld [smem:[#allocation21_spill]] }
  0xcc   : > { %v461_v58 = vsub.s32 2, %v452_v57  ;;  %s325_s9 = scalar_lea.vmem [#allocation7], %s1552_s25  ;;  %s2531_s12 = sshll.u32 %s2783_s11, 5  ;;  %v453_v14 = vsub.s32 0, %v452_v57  ;;  %v457_v17 = vsub.s32 1, %v452_v57 }
  0xcd   : > { %1516 = vmatpush3.bf16.msra.mxu1 %v1766_v25  ;;  %v449_v59 = vld [vmem:[%s325_s9] sm:$0x7]  ;;  %s2534_s24 = scalar_lea.vmem [#allocation11], %s2531_s12  ;;  %s2548_s27 = scalar_lea.vmem [#allocation8], %s2531_s12 }
  0xce   : > { %773 = vmatpush1.bf16.msra.mxu0 %v1738_v16  ;;  %1517 = vmatprep.subr.bf16.mxu1 %v1769_v26  ;;  %v462_v61 = vrot.slane %v449_v59, %v461_v58  ;;  %v2540_v26 = vrot.slane %v449_v59, %v457_v17  ;;  %s2552_s14 = scalar_lea.vmem [#allocation9], %s2531_s12  ;;  %s2841_s3 = sld [smem:[#allocation20_spill]] }
  0xcf   : > { %774 = vmatprep.subr.bf16.mxu0 %v1739_v18  ;;  %s2842_s4 = sld [smem:[#allocation22_spill]]  ;;  %s1048_s1 = sshll.u32 %s2548_s27, 4  ;;  %s2574_s1 = int_to_ptr.vmem [resolvable:$true] %s1048_s1 }
  0xd0   : > { %s1068_s28 = sshll.u32 %s2552_s14, 4  ;;  %s1088_s9 = sshll.u32 %s2534_s24, 4  ;;  %s2578_s28 = int_to_ptr.vmem [resolvable:$true] %s1068_s28  ;;  %s2592_s9 = int_to_ptr.vmem [resolvable:$true] %s1088_s9 }
  0xd1   : > { %1518 = vmatpush3.bf16.msra.mxu1 %v1771_v28  ;;  %s1399_s5 = sshll.u32 %s2840_s22, 3  ;;  %s2843_s12 = sld [smem:[#allocation33_spill]] }
  0xd2   : > { %775 = vmatpush1.bf16.msra.mxu0 %v1741_v21  ;;  %1519 = vmatprep.subr.bf16.mxu1 %v1774_v30  ;;  %s2847_s0 = sld [smem:[#allocation40_spill]]  ;;  %s2848_s7 = sand.u32 1, %s2839_s13  }
  0xd3   : > { %776 = vmatprep.subr.bf16.mxu0 %v1742_v22  ;;  %v2538_v22 = vrot.slane %v449_v59, %v453_v14  ;;  %s2603_s22 = scalar_lea.sflag [#allocation4], %s2848_s7 }
  0xd4   : > { %s1400_s15 = sshll.u32 %s2841_s3, 4  ;;  %s2844_s3 = sld [smem:[#allocation38_spill]] }
  0xd5   : > { %1520 = vmatpush3.bf16.msra.mxu1 %v1776_v33  ;;  %s1043_s21 = sadd.s32 %s1400_s15, %s1399_s5  ;;  %s1401_s10 = sshll.u32 %s2842_s4, 6 }
  0xd6   : > { %777 = vmatpush1.bf16.msra.mxu0 %v1745_v24  ;;  %1521 = vmatprep.subr.bf16.mxu1 %v1779_v34  ;;  %s1045_s16 = sadd.s32 %s1401_s10, %s1043_s21  ;;  %s2845_s21 = sld [smem:[#allocation39_spill]] }
  0xd7   : > { %778 = vmatprep.subr.bf16.mxu0 %v1747_v27  ;;  %s1402_s25 = sshll.u32 %s1045_s16, 6  ;;  %p2849_p1 = scmp.ne.s32.totalorder %s2843_s12, 0 }
  0xd8   : > { %s2598_s2 = scalar_lea.hbm %s2847_s0, %s1402_s25  ;;  %s2122_s5 = smov [#allocation8]  }
  0xd9   : > { %1522 = vmatpush3.bf16.msra.mxu1 %v1781_v37  ;;  %s1891_s15 = sshll.u32 %s2122_s5, 4  ;;  %s1892_s15 = int_to_ptr.vmem [resolvable:$false] %s1891_s15 }
  0xda   : > { %779 = vmatpush1.bf16.msra.mxu0 %v1750_v29  ;;  %s2585_s4 = scalar_lea.hbm %s2844_s3, %s1402_s25  ;;  %p1894_p0 = scmp.lt.s32.totalorder %s2574_s1, %s1892_s15 }
  0xdb   : > { %780 = vmatprep.subr.bf16.mxu0 %v1752_v31 }
  0xdc   : > { %868 = vmatmul.mubr.bf16.vlgmr.msra.gmra.mrb[0].mxu1 %v1782_v40  ;;  %s2846_s10 = smov %s2845_s21  ;;  %s2590_s16 = scalar_lea.hbm %s2845_s21, %s1402_s25 }
  0xdd   : > { %875 = vmatprep.mubr.bf16.mxu1 %v1788_v41  ;;  %s1893_s21 = scalar_lea.vmem %s1892_s15, 1024 }
  0xde   : > { %781 = vmatpush1.bf16.msra.mxu0 %v1755_v32 }
  0xdf   : > { %782 = vmatprep.subr.bf16.mxu0 %v1757_v35 }
  0xe2   : > { %783 = vmatpush1.bf16.msra.mxu0 %v1760_v38 }
  0xe3   : > { %784 = vmatprep.subr.bf16.mxu0 %v1762_v39 }
  0xe4   : > { %876 = vmatmul.mubr.bf16.gmra.mrb[4].mxu1 %v1790_v46 }
  0xe5   : > { %883 = vmatprep.mubr.bf16.mxu1 %v1791_v47 }
  0xe6   : > { %785 = vmatpush1.bf16.msra.mxu0 %v1765_v42 }
  0xe7   : > { %786 = vmatprep.subr.bf16.mxu0 %v1767_v43 }
  0xea   : > { %787 = vmatpush1.bf16.msra.mxu0 %v1770_v44 }
  0xeb   : > { %788 = vmatprep.subr.bf16.mxu0 %v1772_v45 }
  0xec   : > { %884 = vmatmul.mubr.bf16.gmra.mrb[8].mxu1 %v1793_v52 }
  0xed   : > { %891 = vmatprep.mubr.bf16.mxu1 %v1794_v53 }
  0xee   : > { %789 = vmatpush1.bf16.msra.mxu0 %v1775_v48 }
  0xef   : > { %790 = vmatprep.subr.bf16.mxu0 %v1777_v49 }
  0xf2   : > { %791 = vmatpush1.bf16.msra.mxu0 %v1780_v50 }
  0xf3   : > { %792 = vmatprep.subr.bf16.mxu0 %v1785_v51 }
  0xf4   : > { %892 = vmatmul.mubr.bf16.gmra.mrb[12].mxu1 %v1796_v55 }
  0xf6   : > { %793 = vmatpush1.bf16.msra.mxu0 %v1787_v54 }
  0xf9   : > { %795 = vmatmul.mubr.bf16.vlgmr.msra.gmra.mrb[0].mxu0 %v1782_v40 }
  0xfa   : > { %804 = vmatprep.mubr.bf16.mxu0 %v1788_v41 }
 0x101   : > { %805 = vmatmul.mubr.bf16.gmra.mrb[4].mxu0 %v1790_v46 }
 0x102   : > { %814 = vmatprep.mubr.bf16.mxu0 %v1791_v47 }
 0x109   : > { %815 = vmatmul.mubr.bf16.gmra.mrb[8].mxu0 %v1793_v52 }
 0x10a   : > { %824 = vmatprep.mubr.bf16.mxu0 %v1794_v53 }
 0x111   : > { %825 = vmatmul.mubr.bf16.gmra.mrb[12].mxu0 %v1796_v55 }
 0x1af   : > { %v1523_v60 = vpop.f32.mrb[0].mxu1 }
 0x1b0   : > { %v1524_v62 = vpop.f32.mrb[1].mxu1 }
 0x1b1   : > { %v1525_v63 = vadd.f32 %v1524_v62, %v1523_v60  ;;  %v1526_v0 = vpop.f32.mrb[2].mxu1 }
 0x1b2   : > { %v1527_v1 = vpop.f32.mrb[3].mxu1 }
 0x1b3   : > { %v870_v2 = vadd.f32 %v1525_v63, %v462_v61  ;;  %v1528_v3 = vadd.f32 %v1527_v1, %v1526_v0 }
 0x1b5   : > { %v873_v4 = vadd.f32 %v1528_v3, %v462_v61 }
 0x1b7   : > { %v1481_v5 = vpack.c.bf16 %v873_v4, %v870_v2  ;;  %v1529_v6 = vpop.f32.mrb[4].mxu1 }
 0x1b8   : > { %v1530_v7 = vpop.f32.mrb[5].mxu1 }
 0x1b9   : > { %1482 = vst [vmem:[%s2534_s24] sm:$0xff] %v1481_v5   ;;  %v1531_v8 = vadd.f32 %v1530_v7, %v1529_v6  ;;  %v1532_v9 = vpop.f32.mrb[6].mxu1 }
 0x1ba   : > { %v1533_v10 = vpop.f32.mrb[7].mxu1 }
 0x1bb   : > { %v878_v11 = vadd.f32 %v1531_v8, %v462_v61  ;;  %v1534_v12 = vadd.f32 %v1533_v10, %v1532_v9 }
 0x1bd   : > { %v881_v13 = vadd.f32 %v1534_v12, %v462_v61 }
 0x1bf   : > { %v1486_v15 = vpack.c.bf16 %v881_v13, %v878_v11  ;;  %v1535_v16 = vpop.f32.mrb[8].mxu1 }
 0x1c0   : > { %v1536_v18 = vpop.f32.mrb[9].mxu1 }
 0x1c1   : > { %1504 = vst [vmem:[%s2534_s24 + $0x8] sm:$0xff] %v1486_v15   ;;  %v1537_v19 = vadd.f32 %v1536_v18, %v1535_v16  ;;  %v1538_v20 = vpop.f32.mrb[10].mxu1 }
 0x1c2   : > { %v1539_v21 = vpop.f32.mrb[11].mxu1 }
 0x1c3   : > { %v886_v23 = vadd.f32 %v1537_v19, %v462_v61  ;;  %v1540_v24 = vadd.f32 %v1539_v21, %v1538_v20 }
 0x1c5   : > { %v889_v28 = vadd.f32 %v1540_v24, %v462_v61 }
 0x1c7   : > { %v1491_v33 = vpack.c.bf16 %v889_v28, %v886_v23  ;;  %v1541_v34 = vpop.f32.mrb[12].mxu1 }
 0x1c8   : > { %v1542_v37 = vpop.f32.mrb[13].mxu1 }
 0x1c9   : > { %1505 = vst [vmem:[%s2534_s24 + $0x10] sm:$0xff] %v1491_v33   ;;  %v1543_v39 = vadd.f32 %v1542_v37, %v1541_v34  ;;  %v1544_v40 = vpop.f32.mrb[14].mxu1 }
 0x1ca   : > { %v1545_v42 = vpop.f32.mrb[15].mxu1 }
 0x1cb   : > { %v894_v43 = vadd.f32 %v1543_v39, %v462_v61  ;;  %v1546_v44 = vadd.f32 %v1545_v42, %v1544_v40 }
 0x1cc   : > { %v796_v25 = vpop.f32.mrb[0].mxu0 }
 0x1cd   : > { %v798_v27 = vpop.f32.mrb[1].mxu0  ;;  %v797_v30 = vadd.f32 %v796_v25, %v2538_v22  ;;  %v897_v47 = vadd.f32 %v1546_v44, %v462_v61 }
 0x1ce   : > { %v800_v29 = vpop.f32.mrb[2].mxu0  ;;  %v799_v35 = vadd.f32 %v798_v27, %v2540_v26 }
 0x1cf   : > { %v801_v31 = vadd.f32 %v800_v29, %v2538_v22  ;;  %v802_v32 = vpop.f32.mrb[3].mxu0  ;;  %v1496_v52 = vpack.c.bf16 %v897_v47, %v894_v43 }
 0x1d0   : > { %v803_v36 = vadd.f32 %v802_v32, %v2540_v26 }
 0x1d1   : > { %v1441_v38 = vpack.c.bf16 %v801_v31, %v797_v30  ;;  %1506 = vst [vmem:[%s2534_s24 + $0x18] sm:$0xff] %v1496_v52   ;;  %s1887_s24 = scalar_lea.vmem %s2574_s1, 512 }
 0x1d2   : > { %v1461_v41 = vpack.c.bf16 %v803_v36, %v799_v35  ;;  %p1888_p6 = scmp.ne.s32.totalorder %s2574_s1, %s1887_s24  ;;  %p1895_p12 = scmp.lt.s32.totalorder %s1893_s21, %s1887_s24 }
 0x1d3   : > { %1442 = vst [vmem:[%s2548_s27] sm:$0xff] %v1441_v38  }
 0x1d4   : > { %1462 = vst [vmem:[%s2552_s14] sm:$0xff] %v1461_v41   ;;  %v806_v45 = vpop.f32.mrb[4].mxu0  ;;  %p1889_p8 = pnand %p1888_p6, %p2849_p1  ;;  %p1896_p5 = por %p1895_p12, %p1894_p0 }
 0x1d5   : > { %v808_v46 = vpop.f32.mrb[5].mxu0  ;;  %v807_v49 = vadd.f32 %v806_v45, %v2538_v22 }
 0x1d6   : > { %v810_v48 = vpop.f32.mrb[6].mxu0  ;;  %v809_v53 = vadd.f32 %v808_v46, %v2540_v26  ;;  %p1890_p13 = pneg %p1889_p8 }
 0x1d7   : > { %v811_v50 = vadd.f32 %v810_v48, %v2538_v22  ;;  %v812_v51 = vpop.f32.mrb[7].mxu0 }
 0x1d8   : > { %v813_v54 = vadd.f32 %v812_v51, %v2540_v26  ;;  %p1897_p4 = pnand %p1896_p5, %p1890_p13 }
 0x1d9   : > { %v1446_v55 = vpack.c.bf16 %v811_v50, %v807_v49 }
 0x1da   : > { %v1466_v56 = vpack.c.bf16 %v813_v54, %v809_v53 }
 0x1db   : > { %1498 = vst [vmem:[%s2548_s27 + $0x8] sm:$0xff] %v1446_v55  }
 0x1dc   : > { %1501 = vst [vmem:[%s2552_s14 + $0x8] sm:$0xff] %v1466_v56   ;;  %v816_v57 = vpop.f32.mrb[8].mxu0 }
 0x1dd   : > { %v818_v58 = vpop.f32.mrb[9].mxu0  ;;  %v817_v60 = vadd.f32 %v816_v57, %v2538_v22 }
 0x1de   : > { %v820_v59 = vpop.f32.mrb[10].mxu0  ;;  %v819_v63 = vadd.f32 %v818_v58, %v2540_v26 }
 0x1df   : > { %v821_v61 = vadd.f32 %v820_v59, %v2538_v22  ;;  %v822_v62 = vpop.f32.mrb[11].mxu0 }
 0x1e0   : > { %v823_v0 = vadd.f32 %v822_v62, %v2540_v26 }
 0x1e1   : > { %v1451_v1 = vpack.c.bf16 %v821_v61, %v817_v60 }
 0x1e2   : > { %v1471_v2 = vpack.c.bf16 %v823_v0, %v819_v63 }
 0x1e3   : > { %1499 = vst [vmem:[%s2548_s27 + $0x10] sm:$0xff] %v1451_v1  }
 0x1e4   : > { %1502 = vst [vmem:[%s2552_s14 + $0x10] sm:$0xff] %v1471_v2   ;;  %v826_v3 = vpop.f32.mrb[12].mxu0 }
 0x1e5   : > { %v828_v4 = vpop.f32.mrb[13].mxu0  ;;  %v827_v6 = vadd.f32 %v826_v3, %v2538_v22 }
 0x1e6   : > { %v830_v5 = vpop.f32.mrb[14].mxu0  ;;  %v829_v9 = vadd.f32 %v828_v4, %v2540_v26 }
 0x1e7   : > { %v831_v7 = vadd.f32 %v830_v5, %v2538_v22  ;;  %v832_v8 = vpop.f32.mrb[15].mxu0 }
 0x1e8   : > { %v833_v10 = vadd.f32 %v832_v8, %v2540_v26 }
 0x1e9   : > { %v1456_v11 = vpack.c.bf16 %v831_v7, %v827_v6 }
 0x1ea   : > { %v1476_v12 = vpack.c.bf16 %v833_v10, %v829_v9 }
 0x1eb   : > { %1500 = vst [vmem:[%s2548_s27 + $0x18] sm:$0xff] %v1456_v11  }
 0x1ec   : > { %1503 = vst [vmem:[%s2552_s14 + $0x18] sm:$0xff] %v1476_v12  }
 0x1ed   : > { %1900 = shalt.err (!%p1897_p4)
}
 0x1ee   : > { %s1901_s7 = scalar_lea.hbm %s2585_s4, 512  ;;  %s1905_s11 = scalar_lea.hbm %s2844_s3, 8192 }
 0x1ef   : > { %p1902_p3 = scmp.ne.s32.totalorder %s2585_s4, %s1901_s7  ;;  %p1906_p7 = scmp.lt.u32.totalorder %s2585_s4, %s2844_s3 }
 0x1f0   : > { %p1907_p11 = scmp.lt.u32.totalorder %s1905_s11, %s1901_s7  ;;  %p1909_p6 = scmp.lt.u32.totalorder %s1901_s7, %s2585_s4 }
 0x1f1   : > { %p1903_p2 = pnand %p1902_p3, %p2849_p1 }
 0x1f2   : > { %p1908_p10 = por %p1907_p11, %p1906_p7 }
 0x1f3   : > { %p1904_p9 = pneg %p1903_p2 }
 0x1f4   : > { %p1910_p8 = por %p1909_p6, %p1908_p10 }
 0x1f6   : > { %p1911_p13 = pnand %p1910_p8, %p1904_p9 }
 0x1f8   : > { %1914 = shalt.err (!%p1911_p13)
}
 0x1f9   : > { %s2123_s25 = smov 64   ;;  %s2124_s24 = smov 4  }
 0x1fa   : > { %1559 = dma.vmem_to_hbm [thread:$0]  (%p2849_p1), %s2574_s1, 512, %s2585_s4, %s2603_s22, %s2123_s25, %s2123_s25, %s2124_s24  }
 0x1fb   : > { %s2850_s5 = sand.u32 1, %s2835_s29   ;;  %s1915_s21 = scalar_lea.vmem %s2578_s28, 512 }
 0x1fc   : > { %s2632_s15 = scalar_lea.sflag [#allocation10], %s2850_s5  ;;  %p1916_p0 = scmp.ne.s32.totalorder %s2578_s28, %s1915_s21 }
 0x1fd   : > { %s2125_s7 = smov [#allocation9]  }
 0x1fe   : > { %p1917_p12 = pnand %p1916_p0, %p2849_p1  ;;  %s1919_s17 = sshll.u32 %s2125_s7, 4  ;;  %s1920_s17 = int_to_ptr.vmem [resolvable:$false] %s1919_s17 }
 0x1ff   : > { %s1921_s13 = scalar_lea.vmem %s1920_s17, 1024  ;;  %p1922_p4 = scmp.lt.s32.totalorder %s2578_s28, %s1920_s17 }
 0x200   : > { %p1918_p5 = pneg %p1917_p12  ;;  %p1923_p3 = scmp.lt.s32.totalorder %s1921_s13, %s1915_s21 }
 0x202   : > { %p1924_p2 = por %p1923_p3, %p1922_p4 }
 0x204   : > { %p1925_p9 = pnand %p1924_p2, %p1918_p5 }
 0x206   : > { %1928 = shalt.err (!%p1925_p9)
}
 0x207   : > { %s1929_s29 = scalar_lea.hbm %s2590_s16, 512  ;;  %s1933_s22 = scalar_lea.hbm %s2846_s10, 8192 }
 0x208   : > { %p1930_p7 = scmp.ne.s32.totalorder %s2590_s16, %s1929_s29  ;;  %p1934_p6 = scmp.lt.u32.totalorder %s2590_s16, %s2846_s10 }
 0x209   : > { %p1935_p8 = scmp.lt.u32.totalorder %s1933_s22, %s1929_s29  ;;  %p1937_p0 = scmp.lt.u32.totalorder %s1929_s29, %s2590_s16 }
 0x20a   : > { %p1931_p11 = pnand %p1930_p7, %p2849_p1 }
 0x20b   : > { %p1936_p13 = por %p1935_p8, %p1934_p6 }
 0x20c   : > { %p1932_p10 = pneg %p1931_p11 }
 0x20d   : > { %p1938_p12 = por %p1937_p0, %p1936_p13 }
 0x20f   : > { %p1939_p5 = pnand %p1938_p12, %p1932_p10 }
 0x211   : > { %1942 = shalt.err (!%p1939_p5)
}
 0x212   : > { %1560 = dma.vmem_to_hbm [thread:$0]  (%p2849_p1), %s2578_s28, 512, %s2590_s16, %s2632_s15, %s2123_s25, %s2123_s25, %s2124_s24  }
 0x213   : > { %s1943_s14 = scalar_lea.vmem %s2592_s9, 512  ;;  %s2126_s5 = smov [#allocation11]  }
 0x214   : > { %p1944_p4 = scmp.ne.s32.totalorder %s2592_s9, %s1943_s14  ;;  %s1947_s21 = sshll.u32 %s2126_s5, 4  ;;  %s1948_s21 = int_to_ptr.vmem [resolvable:$false] %s1947_s21 }
 0x215   : > { %s1949_s7 = scalar_lea.vmem %s1948_s21, 1024  ;;  %p1950_p9 = scmp.lt.s32.totalorder %s2592_s9, %s1948_s21 }
 0x216   : > { %p1945_p3 = pnand %p1944_p4, %p2849_p1  ;;  %p1951_p7 = scmp.lt.s32.totalorder %s1949_s7, %s1943_s14 }
 0x218   : > { %p1946_p2 = pneg %p1945_p3  ;;  %p1952_p11 = por %p1951_p7, %p1950_p9 }
 0x21a   : > { %p1953_p10 = pnand %p1952_p11, %p1946_p2 }
 0x21c   : > { %1956 = shalt.err (!%p1953_p10)
}
 0x21d   : > { %s1957_s28 = scalar_lea.hbm %s2598_s2, 512  ;;  %s1961_s13 = scalar_lea.hbm %s2847_s0, 8192 }
 0x21e   : > { %p1958_p6 = scmp.ne.s32.totalorder %s2598_s2, %s1957_s28  ;;  %p1962_p0 = scmp.lt.u32.totalorder %s2598_s2, %s2847_s0 }
 0x21f   : > { %p1963_p12 = scmp.lt.u32.totalorder %s1961_s13, %s1957_s28  ;;  %p1965_p4 = scmp.lt.u32.totalorder %s1957_s28, %s2598_s2 }
 0x220   : > { %p1959_p8 = pnand %p1958_p6, %p2849_p1 }
 0x221   : > { %p1964_p5 = por %p1963_p12, %p1962_p0 }
 0x222   : > { %p1960_p13 = pneg %p1959_p8 }
 0x223   : > { %p1966_p3 = por %p1965_p4, %p1964_p5 }
 0x225   : > { %p1967_p2 = pnand %p1966_p3, %p1960_p13 }
 0x227   : > { %1970 = shalt.err (!%p1967_p2)
}
 0x228   : > { %1561 = dma.vmem_to_hbm [thread:$0]  (%p2849_p1), %s2592_s9, 512, %s2598_s2, %s2632_s15, %s2123_s25, %s2123_s25, %s2124_s24  }
 0x229 PF: > { %s2851_s4 = sld [smem:[#allocation16_spill]]  ;;  %s2852_s22 = sld [smem:[#allocation34_spill]] }
 0x22a   : > { %p1586_p9 = scmp.ge.s32.totalorder %s2113_s8, 2 }
 0x22f   : > { %s1103_s11 = sand.u32 1, %s2851_s4   ;;  %p2853_p7 = scmp.ne.s32.totalorder %s2852_s22, 0 }
 0x230   : > { %s1104_s27 = scalar_lea.sflag [#allocation4], %s1103_s11 }
 0x231   : > { %p1576_p11 = pnand %p1586_p9, %p2853_p7 }
 0x233   : > { %2044 = dma.done.wait (!%p1576_p11), %s1104_s27, 512  }
 0x234   : > { %2046 = vsyncadd (!%p1576_p11), %s1104_s27, 4294966784  ;;  %s2854_s12 = sadd.s32 4294967294, %s2113_s8  }
 0x235   : > { %s1112_s14 = sand.u32 1, %s2854_s12  }
 0x236   : > { %s1113_s5 = scalar_lea.sflag [#allocation10], %s1112_s14 }
 0x237   : > { %2048 = dma.done.wait (!%p1576_p11), %s1113_s5, 1024  }
 0x238   : > { %2050 = vsyncadd (!%p1576_p11), %s1113_s5, 4294966272  ;;  %s28_s8 = sadd.s32 1, %s2113_s8   ;;  %s2856_s9 = sld [smem:[#allocation17_spill]] }
 0x239   : > { %p2691_p1 = scmp.ge.s32.totalorder %s28_s8, 18   ;;  %s2857_s25 = smov %s2378_s19 }
 0x23a   : > { %s2858_s21 = sld [smem:[#allocation18_spill]]  ;;  %s2859_s24 = sld [smem:[#allocation27_spill]] }
 0x23b   : > { %s2860_s15 = sld [smem:[#allocation19_spill]]  ;;  %s2861_s7 = smov %s2375_s18 }
 0x23c   : > { %s2862_s29 = sld [smem:[#allocation23_spill]]  ;;  %s2863_s16 = sld [smem:[#allocation25_spill]] }
 0x23d   : > { %s2864_s17 = sld [smem:[#allocation30_spill]]  ;;  %s2865_s13 = sld [smem:[#allocation32_spill]] }
 0x23e   : > { %s2866_s18 = smov %s2856_s9  ;;  %s2867_s19 = smov %s2061_s20 }
 0x23f   : > { %s2868_s20 = smov %s2857_s25  ;;  %s2869_s22 = smov %s2073_s23 }
 0x240   : > { %s2870_s23 = smov %s2859_s24  ;;  %s2872_s25 = smov %s2085_s26 }
 0x241   : > { %s2871_s24 = smov %s2860_s15  ;;  %s2873_s26 = smov %s2861_s7 }
 0x242   : > { %s2874_s27 = smov %s2101_s30  ;;  %s2875_s28 = smov %s2105_s6 }
 0x243   : > { %s2876_s30 = smov %s2863_s16  ;;  %s2877_s6 = smov %s2864_s17 }
 0x244   : > { %s2878_s7 = smov %s2865_s13  ;;  %27 = sbr.rel (!%p2691_p1) target bundleno = 22 (0x16), region = 133 }
 0x24b   :  { %1127 = vsyncpa [#allocation3], 1 }
 0x24c   :  { %1129 = vsyncpa [#allocation3 + $0x1], 1 }
 0x24d   :  { %1130 = vsyncpa [#allocation6], 1 }
 0x24e   :  { %1132 = vsyncpa [#allocation6 + $0x1], 1 }
 0x24f   :  { %1133 = vsyncpa [#allocation4], 1 }
 0x250   :  { %1135 = vsyncpa [#allocation4 + $0x1], 1 }
 0x251   :  { %1136 = vsyncpa [#allocation10], 1 }
 0x252   :  { %1138 = vsyncpa [#allocation10 + $0x1], 1 }

</bundles_post_ra>
